<compile_context>
chip_gen: v7x
topology: tpu7x:2x2x1
jax: 0.10.0
libtpu: 0.0.40
codegen_flags: <defaults>
</compile_context>

<pallas_src>
import numpy as np
import jax
import jax.numpy as jnp
from jax.experimental import pallas as pl
from jax.experimental.pallas import tpu as pltpu


def _round_up(a, b):
    return ((a + b - 1) // b) * b


def _pick_mode_tiling(n_modes, max_batch, cin, cout,
                      working_set_budget=12 * 1024 * 1024):
    """Choose (tile_modes, padded_modes) for the lane (modes-last) axis.

    The footprint is computed from (8,128)-padded f32 VMEM tiles (the actual
    residency, ~32x larger than raw bytes at tiny channel counts), times 2 for
    BlockSpec double buffering, plus the broadcast (B,Cin,Cout,TM) temporaries
    created in the kernel body.
    """
    mp128 = _round_up(max(n_modes, 1), 128)
    words_per_lane = (
        2 * max_batch * _round_up(cin, 8)       # xr, xi input blocks
        + 2 * cin * _round_up(cout, 8)          # wr, wi weight blocks
        + 2 * max_batch * _round_up(cout, 8))   # out_re, out_im output blocks
    words_per_lane *= 2                         # double buffering
    words_per_lane += 4 * max_batch * cin * _round_up(cout, 8)  # broadcast temps
    bytes_per_lane = 4 * words_per_lane

    tile = (working_set_budget // bytes_per_lane) // 128 * 128
    tile = max(128, min(tile, mp128))
    # v7x has two TensorCores: keep >= 2 "parallel" grid steps whenever the
    # padded mode count allows it (at the shipped test size mp128 == 128, so a
    # single step is unavoidable -- the lane tile cannot go below 128).
    if tile >= mp128 and mp128 >= 256:
        tile = max(128, (mp128 // 2) // 128 * 128)
    n_tiles = -(-mp128 // tile)
    return tile, n_tiles * tile


def _spectral_mix_kernel(xr_ref, xi_ref, wr_ref, wi_ref, or_ref, oi_ref):
    # xr/xi: (B, Cin, TM)   wr/wi: (Cin, Cout, TM)   or/oi: (B, Cout, TM)
    # Modes ride the lane axis; the Cin contraction is a VPU broadcast
    # multiply + add (channel counts are tiny).  Explicit 4-real-mul complex
    # product -- no duplicated block-real weight.
    xr = xr_ref[...][:, :, None, :]      # (B, Cin, 1, TM)
    xi = xi_ref[...][:, :, None, :]
    wr = wr_ref[...][None, :, :, :]      # (1, Cin, Cout, TM)
    wi = wi_ref[...][None, :, :, :]
    or_ref[...] = jnp.sum(xr * wr - xi * wi, axis=1)   # (B, Cout, TM)
    oi_ref[...] = jnp.sum(xr * wi + xi * wr, axis=1)


def spectral_channel_mix(xr, xi, wr, wi, *, tile_modes,
                         vmem_limit_bytes=48 * 1024 * 1024):
    """out[b,o,m] = sum_i x[b,i,m] * w[i,o,m] (complex, split into re/im).

    xr, xi: (B, Cin, Mp) float32   (Mp multiple of tile_modes, tile_modes % 128 == 0)
    wr, wi: (Cin, Cout, Mp) float32
    returns: (out_re, out_im), each (B, Cout, Mp) float32
    """
    B, Cin, Mp = xr.shape
    Cout = wr.shape[1]
    assert Mp % tile_modes == 0

    return pl.pallas_call(
        _spectral_mix_kernel,
        out_shape=(jax.ShapeDtypeStruct((B, Cout, Mp), jnp.float32),
                   jax.ShapeDtypeStruct((B, Cout, Mp), jnp.float32)),
        grid_spec=pltpu.PrefetchScalarGridSpec(
            num_scalar_prefetch=0,
            grid=(Mp // tile_modes,),
            in_specs=[
                pl.BlockSpec((B, Cin, tile_modes), lambda m: (0, 0, m)),
                pl.BlockSpec((B, Cin, tile_modes), lambda m: (0, 0, m)),
                pl.BlockSpec((Cin, Cout, tile_modes), lambda m: (0, 0, m)),
                pl.BlockSpec((Cin, Cout, tile_modes), lambda m: (0, 0, m)),
            ],
            out_specs=[
                pl.BlockSpec((B, Cout, tile_modes), lambda m: (0, 0, m)),
                pl.BlockSpec((B, Cout, tile_modes), lambda m: (0, 0, m)),
            ],
        ),
        compiler_params=pltpu.CompilerParams(
            dimension_semantics=("parallel",),
            vmem_limit_bytes=vmem_limit_bytes,
        ),
    )(xr, xi, wr, wi)


class FactorizedSpectralConv2d:
    """JAX/Pallas port of the PyTorch FactorizedSpectralConv2d forward pass."""

    def __init__(self, in_channels, out_channels, modes1, modes2, key, *,
                 max_batch=8):
        self.in_channels = in_channels
        self.out_channels = out_channels
        self.modes1 = modes1
        self.modes2 = modes2
        scale = 1.0 / (in_channels * out_channels)
        k1, k2 = jax.random.split(key)
        # Dense equivalent of tltorch.FactorizedTensor (in, out, m1, m2, 2),
        # initialized ~ scale*N(0,1) exactly as reset_parameters() does.
        # TODO(synk): CP/TT/Tucker factorization structure not reproduced; weights
        # are materialized densely (forward uses .to_tensor(), so semantics match).
        self.weights1 = scale * jax.random.normal(
            k1, (in_channels, out_channels, modes1, modes2, 2), jnp.float32)
        self.weights2 = scale * jax.random.normal(
            k2, (in_channels, out_channels, modes1, modes2, 2), jnp.float32)

        m1, m2 = modes1, modes2
        Cin, Cout = in_channels, out_channels
        MM = m1 * m2
        M = 2 * MM                       # both retained-mode corners

        # Kernel layout chosen once: modes-last (lane-dense), real/imag split,
        # NO block-real duplication.  Pre-padded to the tile multiple here so
        # the constant weight tensor is never re-padded / re-laid-out per call.
        self.tile_modes, self.padded_modes = _pick_mode_tiling(
            M, max_batch, Cin, Cout)
        pad = self.padded_modes - M

        def to_kernel_layout(w, comp):
            a = w[..., comp].reshape(Cin, Cout, MM)            # (Cin, Cout, m1*m2)
            return a

        wr = jnp.concatenate([to_kernel_layout(self.weights1, 0),
                              to_kernel_layout(self.weights2, 0)], axis=-1)
        wi = jnp.concatenate([to_kernel_layout(self.weights1, 1),
                              to_kernel_layout(self.weights2, 1)], axis=-1)
        self.wr = jnp.pad(wr, ((0, 0), (0, 0), (0, pad))).astype(jnp.float32)
        self.wi = jnp.pad(wi, ((0, 0), (0, 0), (0, pad))).astype(jnp.float32)
        # 48 MiB scoped limit: generous for v5e/v6e, still safe on v7x (64 MiB).
        self.vmem_limit_bytes = 48 * 1024 * 1024

    def __call__(self, x):
        # x: (B, Cin, H, W) float32 -- NCHW, same as the PyTorch module.
        B, Cin, H, W = x.shape
        m1, m2 = self.modes1, self.modes2
        Cout = self.out_channels
        Wh = W // 2 + 1
        MM = m1 * m2
        M = 2 * MM

        x_ft = jnp.fft.rfft2(x)                        # (B, Cin, H, Wh) complex64

        # NCHW already has spatial dims last, so collapsing the two retained
        # corners onto a modes-last axis needs no transpose at all.
        top = x_ft[:, :, :m1, :m2].reshape(B, Cin, MM)     # low +freqs
        bot = x_ft[:, :, H - m1:, :m2].reshape(B, Cin, MM)  # "negative" freqs
        # NOTE: if 2*m1 > H the corners overlap; like PyTorch, the second set wins.
        xm = jnp.concatenate([top, bot], axis=-1)          # (B, Cin, M) complex64

        pad = self.padded_modes - M
        xr = jnp.pad(jnp.real(xm), ((0, 0), (0, 0), (0, pad))).astype(jnp.float32)
        xi = jnp.pad(jnp.imag(xm), ((0, 0), (0, 0), (0, pad))).astype(jnp.float32)

        out_re, out_im = spectral_channel_mix(
            xr, xi, self.wr, self.wi,
            tile_modes=self.tile_modes,
            vmem_limit_bytes=self.vmem_limit_bytes)

        out_c = (out_re[..., :M] + 1j * out_im[..., :M]).astype(jnp.complex64)
        out_top = out_c[..., :MM].reshape(B, Cout, m1, m2)
        out_bot = out_c[..., MM:].reshape(B, Cout, m1, m2)

        out_ft = jnp.zeros((B, Cout, H, Wh), dtype=jnp.complex64)
        out_ft = out_ft.at[:, :, :m1, :m2].set(out_top)
        out_ft = out_ft.at[:, :, H - m1:, :m2].set(out_bot)

        return jnp.fft.irfft2(out_ft, s=(H, W))        # (B, Cout, H, W) float32


def _reference_forward(x, w1, w2, m1, m2):
    """Pure-JAX reference mirroring the PyTorch forward exactly."""
    B, Cin, H, W = x.shape
    Cout = w1.shape[1]
    x_ft = jnp.fft.rfft2(x)
    c1 = w1[..., 0] + 1j * w1[..., 1]
    c2 = w2[..., 0] + 1j * w2[..., 1]
    out_ft = jnp.zeros((B, Cout, H, W // 2 + 1), dtype=jnp.complex64)
    out_ft = out_ft.at[:, :, :m1, :m2].set(
        jnp.einsum('bixy,ioxy->boxy', x_ft[:, :, :m1, :m2], c1))
    out_ft = out_ft.at[:, :, H - m1:, :m2].set(
        jnp.einsum('bixy,ioxy->boxy', x_ft[:, :, H - m1:, :m2], c2))
    return jnp.fft.irfft2(out_ft, s=(H, W))


if __name__ == "__main__":
    key = jax.random.PRNGKey(0)
    k_x, k_w = jax.random.split(key)

    B, Cin, Cout, H, W = 2, 4, 4, 16, 16
    modes1, modes2 = 4, 4

    layer = FactorizedSpectralConv2d(Cin, Cout, modes1, modes2, k_w)
    x = jax.random.normal(k_x, (B, Cin, H, W), jnp.float32)

    out = layer(x)
    out = jax.block_until_ready(out)

    ref = _reference_forward(x, layer.weights1, layer.weights2, modes1, modes2)
    ref = jax.block_until_ready(ref)

    assert out.shape == (B, Cout, H, W)
    np.testing.assert_allclose(np.asarray(out), np.asarray(ref), rtol=1e-4, atol=1e-5)
    print("KERNEL_OK")
</pallas_src>

<mosaic_0001>
module attributes {stable_mosaic.version = 11 : i64} {
  func.func @_spectral_mix_kernel(%arg0: i32, %arg1: memref<2x4x128xf32, #tpu.memory_space<vmem>>, %arg2: memref<2x4x128xf32, #tpu.memory_space<vmem>>, %arg3: memref<4x4x128xf32, #tpu.memory_space<vmem>>, %arg4: memref<4x4x128xf32, #tpu.memory_space<vmem>>, %arg5: memref<2x4x128xf32, #tpu.memory_space<vmem>>, %arg6: memref<2x4x128xf32, #tpu.memory_space<vmem>>) attributes {dimension_semantics = [#tpu.dimension_semantics<parallel>], iteration_bounds = array<i64: 1>, scalar_prefetch = 0 : i64, scratch_operands = 0 : i64, tpu.core_type = #tpu.core_type<tc>, window_params = [{transform_indices = @transform_0, window_bounds = array<i64: 2, 4, 128>}, {transform_indices = @transform_1, window_bounds = array<i64: 2, 4, 128>}, {transform_indices = @transform_2, window_bounds = array<i64: 4, 4, 128>}, {transform_indices = @transform_3, window_bounds = array<i64: 4, 4, 128>}, {transform_indices = @transform_4, window_bounds = array<i64: 2, 4, 128>}, {transform_indices = @transform_5, window_bounds = array<i64: 2, 4, 128>}]} {
    %c0 = arith.constant 0 : index
    %c0_0 = arith.constant 0 : index
    %c0_1 = arith.constant 0 : index
    %0 = vector.load %arg1[%c0, %c0_0, %c0_1] : memref<2x4x128xf32, #tpu.memory_space<vmem>>, vector<2x4x128xf32>
    %1 = vector.shape_cast %0 : vector<2x4x128xf32> to vector<2x4x1x128xf32>
    %c0_2 = arith.constant 0 : index
    %c0_3 = arith.constant 0 : index
    %c0_4 = arith.constant 0 : index
    %2 = vector.load %arg2[%c0_2, %c0_3, %c0_4] : memref<2x4x128xf32, #tpu.memory_space<vmem>>, vector<2x4x128xf32>
    %3 = vector.shape_cast %2 : vector<2x4x128xf32> to vector<2x4x1x128xf32>
    %c0_5 = arith.constant 0 : index
    %c0_6 = arith.constant 0 : index
    %c0_7 = arith.constant 0 : index
    %4 = vector.load %arg3[%c0_5, %c0_6, %c0_7] : memref<4x4x128xf32, #tpu.memory_space<vmem>>, vector<4x4x128xf32>
    %5 = vector.shape_cast %4 : vector<4x4x128xf32> to vector<1x4x4x128xf32>
    %c0_8 = arith.constant 0 : index
    %c0_9 = arith.constant 0 : index
    %c0_10 = arith.constant 0 : index
    %6 = vector.load %arg4[%c0_8, %c0_9, %c0_10] : memref<4x4x128xf32, #tpu.memory_space<vmem>>, vector<4x4x128xf32>
    %7 = vector.shape_cast %6 : vector<4x4x128xf32> to vector<1x4x4x128xf32>
    %8 = vector.broadcast %1 : vector<2x4x1x128xf32> to vector<2x4x4x128xf32>
    %9 = vector.broadcast %5 : vector<1x4x4x128xf32> to vector<2x4x4x128xf32>
    %10 = arith.mulf %8, %9 : vector<2x4x4x128xf32>
    %11 = vector.broadcast %3 : vector<2x4x1x128xf32> to vector<2x4x4x128xf32>
    %12 = vector.broadcast %7 : vector<1x4x4x128xf32> to vector<2x4x4x128xf32>
    %13 = arith.mulf %11, %12 : vector<2x4x4x128xf32>
    %14 = arith.subf %10, %13 : vector<2x4x4x128xf32>
    %cst = arith.constant dense<0.000000e+00> : vector<2x4x128xf32>
    %15 = vector.multi_reduction <add>, %14, %cst [1] : vector<2x4x4x128xf32> to vector<2x4x128xf32>
    %c0_11 = arith.constant 0 : index
    %c0_12 = arith.constant 0 : index
    %c0_13 = arith.constant 0 : index
    %16 = vector.load %arg5[%c0_11, %c0_12, %c0_13] : memref<2x4x128xf32, #tpu.memory_space<vmem>>, vector<2x4x128xf32>
    tpu.vector_store %arg5[%c0_11, %c0_12, %c0_13], %15 {strides = array<i32>} : memref<2x4x128xf32, #tpu.memory_space<vmem>>, vector<2x4x128xf32>,
    %17 = vector.broadcast %1 : vector<2x4x1x128xf32> to vector<2x4x4x128xf32>
    %18 = vector.broadcast %7 : vector<1x4x4x128xf32> to vector<2x4x4x128xf32>
    %19 = arith.mulf %17, %18 : vector<2x4x4x128xf32>
    %20 = vector.broadcast %3 : vector<2x4x1x128xf32> to vector<2x4x4x128xf32>
    %21 = vector.broadcast %5 : vector<1x4x4x128xf32> to vector<2x4x4x128xf32>
    %22 = arith.mulf %20, %21 : vector<2x4x4x128xf32>
    %23 = arith.addf %19, %22 : vector<2x4x4x128xf32>
    %cst_14 = arith.constant dense<0.000000e+00> : vector<2x4x128xf32>
    %24 = vector.multi_reduction <add>, %23, %cst_14 [1] : vector<2x4x4x128xf32> to vector<2x4x128xf32>
    %c0_15 = arith.constant 0 : index
    %c0_16 = arith.constant 0 : index
    %c0_17 = arith.constant 0 : index
    %25 = vector.load %arg6[%c0_15, %c0_16, %c0_17] : memref<2x4x128xf32, #tpu.memory_space<vmem>>, vector<2x4x128xf32>
    tpu.vector_store %arg6[%c0_15, %c0_16, %c0_17], %24 {strides = array<i32>} : memref<2x4x128xf32, #tpu.memory_space<vmem>>, vector<2x4x128xf32>,
    return
  }
  func.func @transform_0(%arg0: i32) -> (i32, i32, i32) {
    %c0_i32 = arith.constant 0 : i32
    %c0_i32_0 = arith.constant 0 : i32
    %c0_i32_1 = arith.constant 0 : i32
    return %c0_i32, %c0_i32_0, %arg0 : i32, i32, i32
  }
  func.func @transform_1(%arg0: i32) -> (i32, i32, i32) {
    %c0_i32 = arith.constant 0 : i32
    %c0_i32_0 = arith.constant 0 : i32
    %c0_i32_1 = arith.constant 0 : i32
    return %c0_i32, %c0_i32_0, %arg0 : i32, i32, i32
  }
  func.func @transform_2(%arg0: i32) -> (i32, i32, i32) {
    %c0_i32 = arith.constant 0 : i32
    %c0_i32_0 = arith.constant 0 : i32
    %c0_i32_1 = arith.constant 0 : i32
    return %c0_i32, %c0_i32_0, %arg0 : i32, i32, i32
  }
  func.func @transform_3(%arg0: i32) -> (i32, i32, i32) {
    %c0_i32 = arith.constant 0 : i32
    %c0_i32_0 = arith.constant 0 : i32
    %c0_i32_1 = arith.constant 0 : i32
    return %c0_i32, %c0_i32_0, %arg0 : i32, i32, i32
  }
  func.func @transform_4(%arg0: i32) -> (i32, i32, i32) {
    %c0_i32 = arith.constant 0 : i32
    %c0_i32_0 = arith.constant 0 : i32
    %c0_i32_1 = arith.constant 0 : i32
    return %c0_i32, %c0_i32_0, %arg0 : i32, i32, i32
  }
  func.func @transform_5(%arg0: i32) -> (i32, i32, i32) {
    %c0_i32 = arith.constant 0 : i32
    %c0_i32_0 = arith.constant 0 : i32
    %c0_i32_1 = arith.constant 0 : i32
    return %c0_i32, %c0_i32_0, %arg0 : i32, i32, i32
  }
}

</mosaic_0001>

<bundles_post_ra>
// kernel: tpu_custom_call.1
= control target key start
LH: loop header
LB: loop body
LE: loop exit
PB: predicated region body
PF: predicated region fallthrough
CT: control target
= control target key end

     0   :  { %11 = vsyncpa [#allocation3], 0  ;;  %s772_s0 = inlined_call_operand.hbm [shape: f32[2,4,128], index: 0, kind: input, shape index: {}]   ;;  %s773_s1 = inlined_call_operand.hbm [shape: f32[2,4,128], index: 1, kind: input, shape index: {}]   ;;  %s774_s2 = inlined_call_operand.hbm [shape: f32[4,4,128], index: 2, kind: input, shape index: {}]   ;;  %s775_s3 = inlined_call_operand.hbm [shape: f32[4,4,128], index: 3, kind: input, shape index: {}]   ;;  %s776_s4 = inlined_call_operand.hbm [shape: f32[2,4,128], index: 4, kind: output, shape index: {0}]   ;;  %s777_s5 = inlined_call_operand.hbm [shape: f32[2,4,128], index: 5, kind: output, shape index: {1}]  }
   0x1   :  { %12 = vsyncpa [#allocation6], 0 }
   0x2   :  { %13 = vsyncpa [#allocation9], 0 }
   0x3   :  { %14 = vsyncpa [#allocation4], 0 }
   0x4   :  { %15 = vsyncpa [#allocation12], 0  ;;  %s539_s18 = smov [#allocation5]   ;;  %s540_s20 = smov [#allocation2]  }
   0x5   :  { %s33_s19 = sshll.u32 %s539_s18, 4  ;;  %s21_s21 = sshll.u32 %s540_s20, 4  ;;  %s34_s19 = int_to_ptr.vmem [resolvable:$true] %s33_s19  ;;  %s578_s21 = int_to_ptr.vmem [resolvable:$true] %s21_s21 }
   0x6   :  { %s397_s24 = scalar_lea.hbm %s773_s1, 128 }
   0x7   :  { %p398_p0 = scmp.ne.s32.totalorder %s773_s1, %s397_s24  ;;  %p401_p1 = scmp.lt.u32.totalorder %s397_s24, %s773_s1 }
   0x9   :  { %p403_p2 = pnand %p401_p1, %p398_p0 }
   0xb   :  { %406 = shalt.err (!%p403_p2)
}
   0xc   :  { %s407_s29 = scalar_lea.vmem %s34_s19, 128  ;;  %p412_p4 = scmp.lt.s32.totalorder %s34_s19, %s34_s19 }
   0xd   :  { %p408_p3 = scmp.ne.s32.totalorder %s34_s19, %s407_s29  ;;  %p413_p5 = scmp.lt.s32.totalorder %s407_s29, %s407_s29 }
   0xf   :  { %p414_p6 = por %p413_p5, %p412_p4 }
  0x11   :  { %p415_p7 = pnand %p414_p6, %p408_p3 }
  0x13   :  { %418 = shalt.err (!%p415_p7)
}
  0x14   :  { %s541_s30 = smov 64   ;;  %s542_s6 = smov 4  }
  0x15   :  { %39 = dma.hbm_to_vmem [thread:$0]  %s773_s1, 128, %s34_s19, [#allocation6], %s541_s30, %s541_s30, %s542_s6  }
  0x16   :  { %s419_s11 = scalar_lea.hbm %s772_s0, 128 }
  0x17   :  { %p420_p8 = scmp.ne.s32.totalorder %s772_s0, %s419_s11  ;;  %p423_p9 = scmp.lt.u32.totalorder %s419_s11, %s772_s0 }
  0x19   :  { %p425_p10 = pnand %p423_p9, %p420_p8 }
  0x1b   :  { %428 = shalt.err (!%p425_p10)
}
  0x1c   :  { %s429_s16 = scalar_lea.vmem %s578_s21, 128  ;;  %p434_p12 = scmp.lt.s32.totalorder %s578_s21, %s578_s21 }
  0x1d   :  { %p430_p11 = scmp.ne.s32.totalorder %s578_s21, %s429_s16  ;;  %p435_p13 = scmp.lt.s32.totalorder %s429_s16, %s429_s16 }
  0x1f   :  { %p436_p0 = por %p435_p13, %p434_p12 }
  0x21   :  { %p437_p1 = pnand %p436_p0, %p430_p11 }
  0x23   :  { %440 = shalt.err (!%p437_p1)
}
  0x24   :  { %27 = dma.hbm_to_vmem [thread:$0]  %s772_s0, 128, %s578_s21, [#allocation3], %s541_s30, %s541_s30, %s542_s6  }
  0x25   :  { %s543_s18 = smov [#allocation7]   ;;  %s544_s20 = smov [#allocation8]  }
  0x26   :  { %s45_s19 = sshll.u32 %s543_s18, 4  ;;  %s57_s22 = sshll.u32 %s544_s20, 4  ;;  %s46_s19 = int_to_ptr.vmem [resolvable:$true] %s45_s19  ;;  %s615_s22 = int_to_ptr.vmem [resolvable:$true] %s57_s22 }
  0x27   :  { %s441_s25 = scalar_lea.hbm %s774_s2, 256 }
  0x28   :  { %p442_p2 = scmp.ne.s32.totalorder %s774_s2, %s441_s25  ;;  %p445_p3 = scmp.lt.u32.totalorder %s441_s25, %s774_s2 }
  0x2a   :  { %p447_p4 = pnand %p445_p3, %p442_p2 }
  0x2c   :  { %450 = shalt.err (!%p447_p4)
}
  0x2d   :  { %s451_s0 = scalar_lea.vmem %s46_s19, 256  ;;  %p456_p6 = scmp.lt.s32.totalorder %s46_s19, %s46_s19 }
  0x2e   :  { %p452_p5 = scmp.ne.s32.totalorder %s46_s19, %s451_s0  ;;  %p457_p7 = scmp.lt.s32.totalorder %s451_s0, %s451_s0 }
  0x30   :  { %p458_p8 = por %p457_p7, %p456_p6 }
  0x32   :  { %p459_p9 = pnand %p458_p8, %p452_p5 }
  0x34   :  { %462 = shalt.err (!%p459_p9)
}
  0x35   :  { %51 = dma.hbm_to_vmem [thread:$0]  %s774_s2, 256, %s46_s19, [#allocation6], %s541_s30, %s541_s30, %s542_s6  }
  0x36   :  { %s463_s10 = scalar_lea.hbm %s775_s3, 256 }
  0x37   :  { %p464_p10 = scmp.ne.s32.totalorder %s775_s3, %s463_s10  ;;  %p467_p11 = scmp.lt.u32.totalorder %s463_s10, %s775_s3 }
  0x39   :  { %p469_p12 = pnand %p467_p11, %p464_p10 }
  0x3b   :  { %472 = shalt.err (!%p469_p12)
}
  0x3c   :  { %s473_s15 = scalar_lea.vmem %s615_s22, 256  ;;  %p478_p0 = scmp.lt.s32.totalorder %s615_s22, %s615_s22 }
  0x3d   :  { %p474_p13 = scmp.ne.s32.totalorder %s615_s22, %s473_s15  ;;  %p479_p1 = scmp.lt.s32.totalorder %s473_s15, %s473_s15 }
  0x3f   :  { %p480_p2 = por %p479_p1, %p478_p0 }
  0x41   :  { %p481_p3 = pnand %p480_p2, %p474_p13 }
  0x43   :  { %484 = shalt.err (!%p481_p3)
}
  0x44   :  { %63 = dma.hbm_to_vmem [thread:$0]  %s775_s3, 256, %s615_s22, [#allocation9], %s541_s30, %s541_s30, %s542_s6  }
  0x45   :  { %529 = dma.done.wait [#allocation3], 128  }
  0x46   :  { %530 = vsyncadd [#allocation3], 4294967168 }
  0x47   :  { %531 = dma.done.wait [#allocation6], 384  }
  0x48   :  { %532 = vsyncadd [#allocation6], 4294966912 }
  0x49   :  { %533 = dma.done.wait [#allocation9], 256  }
  0x4a   :  { %534 = vsyncadd [#allocation9], 4294967040  ;;  %v91_v0 = vlaneseq  ;;  %v545_v1 = vmov 1966171168   ;;  %v654_v13 = vld [vmem:[#allocation7] sm:$0xf] }
  0x4b   :  { %v89_v2 = vunpack.c.l.s4 %v545_v1  ;;  %v384_v7 = vld.sshfl [vmem:[#allocation2] sm:$0x33 pattern:$0x75316420]  ;;  %v656_v16 = vld [vmem:[#allocation7 + $0x4] sm:$0xf] }
  0x4c   :  { %v92_v3 = vshrl.u32 %v91_v0, 7  ;;  %v87_v8 = vcombine.high %v384_v7, %v384_v7  ;;  %v386_v10 = vld.sshfl [vmem:[#allocation5] sm:$0x33 pattern:$0x75316420]  ;;  %vm292_vm0 = vcmask 1043456  }
  0x4d   :  { %v90_v4 = vunpack.c.0.s8 %v89_v2  ;;  %v139_v11 = vcombine.high %v386_v10, %v386_v10  ;;  %v658_v17 = vld [vmem:[#allocation8] sm:$0xf]  ;;  %v663_v21 = vld [vmem:[#allocation7 + $0x8] sm:$0xf]  ;;  %v668_v25 = vld [vmem:[#allocation8 + $0x4] sm:$0xf] }
  0x4e   :  { %v652_v6 = vsub.s32 0, %v92_v3  ;;  %v385_v23 = vld.sshfl [vmem:[#allocation2 + $0x4] sm:$0x33 pattern:$0x75316420]  ;;  %s546_s3 = smov [#allocation10]  }
  0x4f   :  { %v93_v5 = vsub.s32 %v90_v4, %v92_v3  ;;  %v670_v26 = vld [vmem:[#allocation8 + $0x8] sm:$0xf]  ;;  %v676_v31 = vld [vmem:[#allocation7 + $0xc] sm:$0xf]  ;;  %v682_v36 = vld [vmem:[#allocation8 + $0xc] sm:$0xf]  ;;  %v111_v40 = vcombine.high %v385_v23, %v385_v23 }
  0x50   :  { %v387_v35 = vld.sshfl [vmem:[#allocation5 + $0x4] sm:$0x33 pattern:$0x75316420]  ;;  %s354_s1 = sshll.u32 %s546_s3, 4  ;;  %s355_s1 = int_to_ptr.vmem [resolvable:$true] %s354_s1 }
  0x51   :  { %v94_v9 = vrot.slane %v384_v7, %v93_v5  ;;  %v146_v12 = vrot.slane %v386_v10, %v93_v5  ;;  %v101_v14 = vrot.slane %v87_v8, %v93_v5  ;;  %v153_v19 = vrot.slane %v139_v11, %v93_v5  ;;  %s485_s17 = scalar_lea.vmem %s355_s1, 128  ;;  %p490_p5 = scmp.lt.s32.totalorder %s355_s1, %s355_s1 }
  0x52   :  { %v118_v46 = vrot.slane %v385_v23, %v93_v5  ;;  %v125_v47 = vrot.slane %v111_v40, %v93_v5  ;;  %v163_v48 = vcombine.high %v387_v35, %v387_v35  ;;  %v170_v55 = vrot.slane %v387_v35, %v93_v5  ;;  %p486_p4 = scmp.ne.s32.totalorder %s355_s1, %s485_s17  ;;  %p491_p6 = scmp.lt.s32.totalorder %s485_s17, %s485_s17 }
  0x53   :  { %v102_v15 = vcombine.high %v94_v9, %v94_v9  ;;  %v661_v18 = vrot.slane %v94_v9, %v652_v6  ;;  %v154_v20 = vcombine.high %v146_v12, %v146_v12  ;;  %v666_v22 = vrot.slane %v146_v12, %v652_v6 }
  0x54   :  { %v103_v24 = vcombine.high %v101_v14, %v101_v14  ;;  %v195_v27 = vrot.slane %v101_v14, %v652_v6  ;;  %v155_v30 = vcombine.high %v153_v19, %v153_v19  ;;  %v243_v32 = vrot.slane %v153_v19, %v652_v6  ;;  %p492_p7 = por %p491_p6, %p490_p5 }
  0x55   :  { %v199_v28 = vrot.slane %v102_v15, %v652_v6  ;;  %v228_v29 = vmul.f32 %v661_v18, %v654_v13  ;;  %v247_v33 = vrot.slane %v154_v20, %v652_v6  ;;  %v276_v34 = vmul.f32 %v666_v22, %v658_v17 }
  0x56   :  { %v203_v37 = vrot.slane %v103_v24, %v652_v6  ;;  %v229_v38 = vmul.f32 %v195_v27, %v656_v16  ;;  %v251_v41 = vrot.slane %v155_v30, %v652_v6  ;;  %v277_v42 = vmul.f32 %v243_v32, %v668_v25  ;;  %p493_p8 = pnand %p492_p7, %p486_p4 }
  0x57   :  { %v230_v39 = vmul.f32 %v199_v28, %v663_v21  ;;  %v278_v43 = vmul.f32 %v247_v33, %v670_v26  ;;  %v284_v44 = vsub.f32 %v228_v29, %v276_v34  ;;  %v126_v53 = vcombine.high %v118_v46, %v118_v46 }
  0x58   :  { %v231_v45 = vmul.f32 %v203_v37, %v676_v31  ;;  %v279_v49 = vmul.f32 %v251_v41, %v682_v36  ;;  %v285_v50 = vsub.f32 %v229_v38, %v277_v42  ;;  %v127_v54 = vcombine.high %v125_v47, %v125_v47 }
  0x59   :  { %v286_v51 = vsub.f32 %v230_v39, %v278_v43  ;;  %v293_v52 = vsel %vm292_vm0, %v284_v44, 0.0  ;;  %v177_v56 = vrot.slane %v163_v48, %v93_v5  ;;  %v207_v60 = vrot.slane %v118_v46, %v652_v6 }
  0x5a   :  { %v287_v57 = vsub.f32 %v231_v45, %v279_v49  ;;  %v294_v58 = vsel %vm292_vm0, %v285_v50, 0.0  ;;  %v178_v62 = vcombine.high %v170_v55, %v170_v55  ;;  %v211_v0 = vrot.slane %v125_v47, %v652_v6 }
  0x5b   :  { %v296_v59 = vsel %vm292_vm0, %v286_v51, 0.0  ;;  %v295_v61 = vadd.f32 %v294_v58, %v293_v52  ;;  %v179_v63 = vcombine.high %v177_v56, %v177_v56  ;;  %v215_v2 = vrot.slane %v126_v53, %v652_v6 }
  0x5c   :  { %v298_v1 = vsel %vm292_vm0, %v287_v57, 0.0  ;;  %v219_v3 = vrot.slane %v127_v54, %v652_v6  ;;  %v232_v4 = vmul.f32 %v207_v60, %v654_v13  ;;  %v233_v7 = vmul.f32 %v211_v0, %v656_v16 }
  0x5d   :  { %v297_v5 = vadd.f32 %v296_v59, %v295_v61  ;;  %v255_v8 = vrot.slane %v170_v55, %v652_v6  ;;  %v259_v9 = vrot.slane %v177_v56, %v652_v6  ;;  %v234_v10 = vmul.f32 %v215_v2, %v663_v21 }
  0x5e   :  { %v235_v11 = vmul.f32 %v219_v3, %v676_v31  ;;  %v263_v12 = vrot.slane %v178_v62, %v652_v6  ;;  %v267_v14 = vrot.slane %v179_v63, %v652_v6  ;;  %v309_v23 = vmul.f32 %v661_v18, %v658_v17 }
  0x5f   :  { %v299_v15 = vadd.f32 %v298_v1, %v297_v5  ;;  %v280_v19 = vmul.f32 %v255_v8, %v658_v17  ;;  %v281_v20 = vmul.f32 %v259_v9, %v668_v25  ;;  %v310_v30 = vmul.f32 %v195_v27, %v668_v25 }
  0x60   :  { %v282_v24 = vmul.f32 %v263_v12, %v670_v26  ;;  %v283_v29 = vmul.f32 %v267_v14, %v682_v36  ;;  %v311_v34 = vmul.f32 %v199_v28, %v670_v26  ;;  %v312_v6 = vmul.f32 %v203_v37, %v682_v36 }
  0x61   :  { %307 = vst [vmem:[#allocation10] sm:$0xf] %v299_v15  ;;  %v288_v35 = vsub.f32 %v232_v4, %v280_v19  ;;  %v289_v38 = vsub.f32 %v233_v7, %v281_v20  ;;  %v317_v39 = vmul.f32 %v666_v22, %v654_v13  ;;  %v318_v18 = vmul.f32 %v243_v32, %v656_v16 }
  0x62   :  { %v290_v40 = vsub.f32 %v234_v10, %v282_v24  ;;  %v291_v42 = vsub.f32 %v235_v11, %v283_v29  ;;  %v319_v43 = vmul.f32 %v247_v33, %v663_v21  ;;  %v320_v28 = vmul.f32 %v251_v41, %v676_v31 }
  0x63   :  { %v300_v44 = vsel %vm292_vm0, %v288_v35, 0.0  ;;  %v301_v27 = vsel %vm292_vm0, %v289_v38, 0.0  ;;  %v325_v45 = vadd.f32 %v317_v39, %v309_v23  ;;  %v326_v48 = vadd.f32 %v318_v18, %v310_v30 }
  0x64   :  { %v302_v46 = vadd.f32 %v301_v27, %v300_v44  ;;  %v303_v47 = vsel %vm292_vm0, %v290_v40, 0.0  ;;  %v305_v37 = vsel %vm292_vm0, %v291_v42, 0.0  ;;  %v327_v22 = vadd.f32 %v319_v43, %v311_v34 }
  0x65   :  { %v328_v49 = vadd.f32 %v320_v28, %v312_v6  ;;  %v333_v50 = vsel %vm292_vm0, %v325_v45, 0.0  ;;  %v313_v32 = vmul.f32 %v207_v60, %v658_v17  ;;  %v334_v51 = vsel %vm292_vm0, %v326_v48, 0.0 }
  0x66   :  { %v304_v33 = vadd.f32 %v303_v47, %v302_v46  ;;  %v314_v41 = vmul.f32 %v211_v0, %v668_v25  ;;  %v315_v52 = vmul.f32 %v215_v2, %v670_v26  ;;  %v335_v53 = vadd.f32 %v334_v51, %v333_v50 }
  0x67   :  { %v336_v54 = vsel %vm292_vm0, %v327_v22, 0.0  ;;  %v338_v55 = vsel %vm292_vm0, %v328_v49, 0.0  ;;  %v316_v56 = vmul.f32 %v219_v3, %v682_v36  ;;  %v321_v58 = vmul.f32 %v255_v8, %v654_v13 }
  0x68   :  { %v306_v57 = vadd.f32 %v305_v37, %v304_v33  ;;  %v322_v17 = vmul.f32 %v259_v9, %v656_v16  ;;  %v323_v59 = vmul.f32 %v263_v12, %v663_v21  ;;  %v337_v60 = vadd.f32 %v336_v54, %v335_v53 }
  0x69   :  { %v324_v25 = vmul.f32 %v267_v14, %v676_v31  ;;  %v329_v26 = vadd.f32 %v321_v58, %v313_v32 }
  0x6a   :  { %308 = vst [vmem:[#allocation10 + $0x4] sm:$0xf] %v306_v57  ;;  %v330_v61 = vadd.f32 %v322_v17, %v314_v41  ;;  %v331_v62 = vadd.f32 %v323_v59, %v315_v52  ;;  %v339_v63 = vadd.f32 %v338_v55, %v337_v60 }
  0x6b   :  { %v332_v0 = vadd.f32 %v324_v25, %v316_v56 }
  0x6c   :  { %496 = shalt.err (!%p493_p8)
}
  0x6d   :  { %s497_s20 = scalar_lea.hbm %s776_s4, 128 }
  0x6e   :  { %p498_p9 = scmp.ne.s32.totalorder %s776_s4, %s497_s20  ;;  %p501_p10 = scmp.lt.u32.totalorder %s497_s20, %s776_s4 }
  0x70   :  { %p503_p11 = pnand %p501_p10, %p498_p9 }
  0x72   :  { %506 = shalt.err (!%p503_p11)
}
  0x73   :  { %360 = dma.vmem_to_hbm [thread:$0]  %s355_s1, 128, %s776_s4, [#allocation4], %s541_s30, %s541_s30, %s542_s6   ;;  %v340_v13 = vsel %vm292_vm0, %v329_v26, 0.0  ;;  %v341_v16 = vsel %vm292_vm0, %v330_v61, 0.0  ;;  %v343_v21 = vsel %vm292_vm0, %v331_v62, 0.0  ;;  %v345_v36 = vsel %vm292_vm0, %v332_v0, 0.0 }
  0x74   :  { %347 = vst [vmem:[#allocation11] sm:$0xf] %v339_v63  ;;  %v342_v31 = vadd.f32 %v341_v16, %v340_v13  ;;  %s547_s28 = smov [#allocation11]  }
  0x75   :  { %s366_s29 = sshll.u32 %s547_s28, 4  ;;  %s367_s29 = int_to_ptr.vmem [resolvable:$true] %s366_s29 }
  0x76   :  { %v344_v1 = vadd.f32 %v343_v21, %v342_v31  ;;  %s507_s0 = scalar_lea.vmem %s367_s29, 128  ;;  %p512_p13 = scmp.lt.s32.totalorder %s367_s29, %s367_s29 }
  0x77   :  { %p508_p12 = scmp.ne.s32.totalorder %s367_s29, %s507_s0  ;;  %p513_p0 = scmp.lt.s32.totalorder %s507_s0, %s507_s0 }
  0x78   :  { %v346_v2 = vadd.f32 %v345_v36, %v344_v1 }
  0x79   :  { %p514_p1 = por %p513_p0, %p512_p13 }
  0x7a   :  { %348 = vst [vmem:[#allocation11 + $0x4] sm:$0xf] %v346_v2 }
  0x7b   :  { %p515_p2 = pnand %p514_p1, %p508_p12 }
  0x7d   :  { %518 = shalt.err (!%p515_p2)
}
  0x7e   :  { %s519_s7 = scalar_lea.hbm %s777_s5, 128 }
  0x7f   :  { %p520_p3 = scmp.ne.s32.totalorder %s777_s5, %s519_s7  ;;  %p523_p4 = scmp.lt.u32.totalorder %s519_s7, %s777_s5 }
  0x81   :  { %p525_p5 = pnand %p523_p4, %p520_p3 }
  0x83   :  { %528 = shalt.err (!%p525_p5)
}
  0x84   :  { %372 = dma.vmem_to_hbm [thread:$0]  %s367_s29, 128, %s777_s5, [#allocation12], %s541_s30, %s541_s30, %s542_s6  }
  0x85   :  { %535 = dma.done.wait [#allocation4], 128  }
  0x86   :  { %536 = vsyncadd [#allocation4], 4294967168 }
  0x87   :  { %537 = dma.done.wait [#allocation12], 128  }
  0x88   :  { %538 = vsyncadd [#allocation12], 4294967168 }
  0x89   :  { %379 = vsyncpa [#allocation3], 1 }
  0x8a   :  { %380 = vsyncpa [#allocation6], 1 }
  0x8b   :  { %381 = vsyncpa [#allocation9], 1 }
  0x8c   :  { %382 = vsyncpa [#allocation4], 1 }
  0x8d   :  { %383 = vsyncpa [#allocation12], 1 }

</bundles_post_ra>
